<compile_context>
chip_gen: v5e
topology: v5e:2x2
jax: 0.10.0
libtpu: 0.0.40
codegen_flags: <defaults>
</compile_context>

<pallas_src>
import math
import functools

import jax
import jax.numpy as jnp
from jax.experimental import pallas as pl
from jax.experimental.pallas import tpu as pltpu

_EPS = 1e-12  # F.normalize eps


def _round_up(a, b):
    return ((a + b - 1) // b) * b


def _arcface_kernel(x_ref, w_ref, lab_ref, o_ref, *,
                    s, cos_m, sin_m, th, mm, easy_margin, tn, matmul_dtype):
    # x_ref   : (tm, K)   un-normalized input rows (normalized here, once per tile)
    # w_ref   : (tn, K)   PRE-normalized prototype rows (bf16/f32)
    # lab_ref : (tm, 1)   int32 class label per row
    # o_ref   : (tm, tn)  fused ArcFace logits
    x = x_ref[...].astype(jnp.float32)

    # F.normalize(v) = v / max(||v||_2, eps)   (row-wise)
    x_norm = jnp.sqrt(jnp.sum(x * x, axis=-1, keepdims=True))
    x_n = (x / jnp.maximum(x_norm, _EPS)).astype(matmul_dtype)

    w_n = w_ref[...]  # prototypes arrive already normalized (hoisted out)

    # cosine = x_n @ w_n.T  -- contract last dims directly, no transpose, MXU,
    # bf16 inputs / f32 accumulation.
    cosine = jax.lax.dot_general(
        x_n, w_n,
        dimension_numbers=(((1,), (1,)), ((), ())),
        preferred_element_type=jnp.float32)

    sine2 = 1.0 - cosine * cosine
    sine = jnp.sqrt(jnp.where(sine2 > 0, sine2, 0.0))
    phi = cosine * cos_m - sine * sin_m
    if easy_margin:
        phi = jnp.where(cosine > 0, phi, cosine)
    else:
        phi = jnp.where(cosine - th > 0, phi, cosine - mm)

    # one-hot mix as a single predicated select.  Grid axis 0 = class-tile idx.
    col0 = pl.program_id(0) * tn
    cols = col0 + jax.lax.broadcasted_iota(jnp.int32, cosine.shape, 1)
    out = jnp.where(cols == lab_ref[...], phi, cosine) * s
    o_ref[...] = out.astype(o_ref.dtype)


def arcface_pallas(x, weight_n, label, *, n_classes=None,
                   s=32.0, m=0.5, easy_margin=False,
                   tm=256, tn=512, out_dtype=jnp.float32):
    """Fused normalize(x) + linear + ArcFace-margin + one-hot select + scale.

    `weight_n` must be PRE-L2-normalized class prototypes (rows), possibly
    already zero-padded along the class dim; `n_classes` is the number of
    valid classes (defaults to weight_n.shape[0]).
    """
    Mb, K = x.shape
    N_rows, K2 = weight_n.shape
    assert K == K2
    N = N_rows if n_classes is None else n_classes
    label = label.astype(jnp.int32)

    # Tile sizes: MXU-friendly defaults, clamped for small problems.
    tm = min(tm, _round_up(Mb, 8))
    tn = min(tn, _round_up(N, 128))
    Mp = _round_up(Mb, tm)
    Np = _round_up(N_rows, tn)

    x_p = x if Mp == Mb else jnp.pad(x, ((0, Mp - Mb), (0, 0)))
    w_p = weight_n if Np == N_rows else jnp.pad(weight_n, ((0, Np - N_rows), (0, 0)))
    lab = label if Mp == Mb else jnp.pad(label, (0, Mp - Mb))
    lab_p = lab.reshape(-1, 1)

    kernel = functools.partial(
        _arcface_kernel, s=float(s),
        cos_m=math.cos(m), sin_m=math.sin(m),
        th=math.cos(math.pi - m), mm=math.sin(math.pi - m) * m,
        easy_margin=easy_margin, tn=tn, matmul_dtype=weight_n.dtype)

    # Explicit VMEM budget (double-buffered tiles), capped at 64 MiB for v7x.
    # TODO(synk): for very large in_features (K >~ 4096 with big tn), add a K
    # grid axis with an f32 accumulator + precomputed inverse norms.
    est = 2 * (tm * K * jnp.dtype(x.dtype).itemsize
               + tn * K * jnp.dtype(weight_n.dtype).itemsize
               + tm * tn * jnp.dtype(out_dtype).itemsize
               + tm * 4)
    vmem_limit = int(min(max(2 * est, 32 * 1024 * 1024), 64 * 1024 * 1024))

    # Grid: class tiles OUTER, row tiles INNER -> the big prototype matrix is
    # DMA'd from HBM exactly once; only the small x / label / output tiles
    # change every inner step.
    grid = (Np // tn, Mp // tm)

    out = pl.pallas_call(
        kernel,
        out_shape=jax.ShapeDtypeStruct((Mp, Np), out_dtype),
        grid_spec=pltpu.PrefetchScalarGridSpec(
            num_scalar_prefetch=0,
            grid=grid,
            in_specs=[
                pl.BlockSpec((tm, K), lambda j, i: (i, 0)),   # x rows (inner)
                pl.BlockSpec((tn, K), lambda j, i: (j, 0)),   # prototypes (outer)
                pl.BlockSpec((tm, 1), lambda j, i: (i, 0)),   # labels
            ],
            out_specs=pl.BlockSpec((tm, tn), lambda j, i: (i, j)),
        ),
        compiler_params=pltpu.CompilerParams(
            dimension_semantics=("parallel", "parallel"),
            vmem_limit_bytes=vmem_limit),
    )(x_p, w_p, lab_p)
    return out[:Mb, :N]


def arc_margin_forward(weight, x, label, unlabel_x=None, unlabel_aug=None, *,
                       overlap=False, dropout_key=None,
                       s=32.0, m=0.5, easy_margin=False,
                       matmul_dtype=jnp.bfloat16, tm=256, tn=512):
    """JAX/Pallas port of ArcMarginProduct_virface.forward (overlap=False path)."""
    out_features = weight.shape[0]

    def nrm(v):
        return v / jnp.maximum(
            jnp.sqrt(jnp.sum(v * v, axis=-1, keepdims=True)), _EPS)

    if unlabel_x is not None:
        # TODO(synk): overlap=True uses data-dependent boolean row filtering
        # (dynamic output shape) — no static-shape Pallas/JAX equivalent; only
        # overlap=False (idx = all ones) is implemented.
        assert not overlap, "overlap=True not supported"
        unlabel_data = unlabel_x
        weight_all_n = jnp.concatenate([nrm(weight), nrm(unlabel_data)], axis=0)
        if dropout_key is not None:  # nn.Dropout(0.5), training mode
            keep = jax.random.bernoulli(dropout_key, 0.5, x.shape)
            x = jnp.where(keep, x / 0.5, 0.0)
    else:
        weight_all_n = nrm(weight)

    n_total = weight_all_n.shape[0]
    # Normalize + cast + pad the (large) prototype matrix ONCE per forward and
    # reuse it for both pallas calls below.
    weight_all_n = weight_all_n.astype(matmul_dtype)
    tn_eff = min(tn, _round_up(n_total, 128))
    Np = _round_up(n_total, tn_eff)
    if Np != n_total:
        weight_all_n = jnp.pad(weight_all_n, ((0, Np - n_total), (0, 0)))

    output_label = arcface_pallas(x, weight_all_n, label, n_classes=n_total,
                                  s=s, m=m, easy_margin=easy_margin,
                                  tm=tm, tn=tn)

    if unlabel_aug is None or unlabel_x is None:
        return output_label, None, None

    n_rep = unlabel_aug.shape[0] // unlabel_x.shape[0]
    aug_data = unlabel_aug  # with idx = all-True, the gather/concat is identity
    unlabel_label = jnp.tile(
        jnp.arange(out_features, out_features + unlabel_data.shape[0],
                   dtype=jnp.int32), n_rep)
    output_unlabel = arcface_pallas(aug_data, weight_all_n, unlabel_label,
                                    n_classes=n_total, s=s, m=m,
                                    easy_margin=easy_margin, tm=tm, tn=tn)
    return output_label, output_unlabel, unlabel_label


# --------------------------- reference (pure JAX) ---------------------------
def _ref_arcface(x, weight, label, *, s, m, easy_margin,
                 matmul_dtype=jnp.float32):
    def nrm(v):
        return v / jnp.maximum(
            jnp.sqrt(jnp.sum(v * v, axis=-1, keepdims=True)), _EPS)
    cos_m, sin_m = math.cos(m), math.sin(m)
    th, mm = math.cos(math.pi - m), math.sin(math.pi - m) * m
    x_n = nrm(x).astype(matmul_dtype)
    w_n = nrm(weight).astype(matmul_dtype)
    cosine = jnp.dot(x_n, w_n.T,
                     preferred_element_type=jnp.float32).astype(jnp.float32)
    sine = jnp.sqrt(jnp.where(1.0 - cosine**2 > 0, 1.0 - cosine**2, 0.0))
    phi = cosine * cos_m - sine * sin_m
    if easy_margin:
        phi = jnp.where(cosine > 0, phi, cosine)
    else:
        phi = jnp.where(cosine - th > 0, phi, cosine - mm)
    one_hot = jax.nn.one_hot(label, cosine.shape[1], dtype=jnp.float32)
    return (one_hot * phi + (1.0 - one_hot) * cosine) * s


if __name__ == "__main__":
    # small, deterministic example shapes
    in_features = 128
    out_features = 200          # exercises class-dim padding (pads to 256)
    batch = 16
    n_unlabel = 8
    n_aug = 2                   # unlabel_aug has n_aug * n_unlabel rows
    s_, m_ = 32.0, 0.5

    key = jax.random.PRNGKey(0)
    k_w, k_x, k_l, k_u, k_a, k_drop = jax.random.split(key, 6)

    # xavier_uniform_ on (out_features, in_features)
    bound = math.sqrt(6.0 / (in_features + out_features))
    weight = jax.random.uniform(k_w, (out_features, in_features),
                                minval=-bound, maxval=bound, dtype=jnp.float32)
    x = jax.random.normal(k_x, (batch, in_features), dtype=jnp.float32)
    label = jax.random.randint(k_l, (batch,), 0, out_features, dtype=jnp.int32)
    unlabel_x = jax.random.normal(k_u, (n_unlabel, in_features), dtype=jnp.float32)
    unlabel_aug = jax.random.normal(k_a, (n_aug * n_unlabel, in_features),
                                    dtype=jnp.float32)

    # ---- path 1: labeled only (unlabel_x=None) ----
    out1, o_unl1, lab_unl1 = arc_margin_forward(weight, x, label, s=s_, m=m_)
    out1 = jax.block_until_ready(out1)
    assert o_unl1 is None and lab_unl1 is None
    # tight check vs. a reference using the same bf16 matmul precision
    ref1_bf16 = _ref_arcface(x, weight, label, s=s_, m=m_, easy_margin=False,
                             matmul_dtype=jnp.bfloat16)
    assert jnp.allclose(out1, ref1_bf16, atol=2e-2, rtol=1e-2), \
        "labeled path mismatch (bf16-matched ref)"
    # loose numerics sanity check vs. full-f32 reference
    ref1_f32 = _ref_arcface(x, weight, label, s=s_, m=m_, easy_margin=False)
    assert jnp.allclose(out1, ref1_f32, atol=0.3, rtol=0.05), \
        "labeled path numerics drifted too far from f32 reference"

    # ---- path 2: with unlabeled data + augmentations (overlap=False) ----
    out2, out_unl, lab_unl = arc_margin_forward(
        weight, x, label, unlabel_x, unlabel_aug,
        overlap=False, dropout_key=k_drop, s=s_, m=m_)
    out2, out_unl, lab_unl = jax.block_until_ready((out2, out_unl, lab_unl))

    # reference (same dropout mask, same weight_all construction)
    keep = jax.random.bernoulli(k_drop, 0.5, x.shape)
    x_drop = jnp.where(keep, x / 0.5, 0.0)
    w_all = jnp.concatenate([weight, unlabel_x], axis=0)
    ref2 = _ref_arcface(x_drop, w_all, label, s=s_, m=m_, easy_margin=False,
                        matmul_dtype=jnp.bfloat16)
    ref_unl_lab = jnp.tile(jnp.arange(out_features, out_features + n_unlabel,
                                      dtype=jnp.int32), n_aug)
    ref_unl = _ref_arcface(unlabel_aug, w_all, ref_unl_lab, s=s_, m=m_,
                           easy_margin=False, matmul_dtype=jnp.bfloat16)
    assert out2.shape == (batch, out_features + n_unlabel)
    assert out_unl.shape == (n_aug * n_unlabel, out_features + n_unlabel)
    assert jnp.array_equal(lab_unl, ref_unl_lab), "unlabel labels mismatch"
    assert jnp.allclose(out2, ref2, atol=2e-2, rtol=1e-2), \
        "unlabel-path label output mismatch"
    assert jnp.allclose(out_unl, ref_unl, atol=2e-2, rtol=1e-2), \
        "unlabel output mismatch"

    print("KERNEL_OK")
</pallas_src>

<mosaic_0001>
module attributes {stable_mosaic.version = 11 : i64} {
  func.func @_arcface_kernel(%arg0: i32, %arg1: i32, %arg2: memref<16x128xf32, #tpu.memory_space<vmem>>, %arg3: memref<256x128xbf16, #tpu.memory_space<vmem>>, %arg4: memref<16x1xi32, #tpu.memory_space<vmem>>, %arg5: memref<16x256xf32, #tpu.memory_space<vmem>>) attributes {dimension_semantics = [#tpu.dimension_semantics<parallel>, #tpu.dimension_semantics<parallel>], iteration_bounds = array<i64: 1, 1>, scalar_prefetch = 0 : i64, scratch_operands = 0 : i64, tpu.core_type = #tpu.core_type<tc>, window_params = [{transform_indices = @transform_0, window_bounds = array<i64: 16, 128>}, {transform_indices = @transform_1, window_bounds = array<i64: 256, 128>}, {transform_indices = @transform_2, window_bounds = array<i64: 16, 1>}, {transform_indices = @transform_3, window_bounds = array<i64: 16, 256>}]} {
    %c0 = arith.constant 0 : index
    %c0_0 = arith.constant 0 : index
    %0 = vector.load %arg2[%c0, %c0_0] : memref<16x128xf32, #tpu.memory_space<vmem>>, vector<16x128xf32>
    %1 = arith.mulf %0, %0 : vector<16x128xf32>
    %cst = arith.constant dense<0.000000e+00> : vector<16xf32>
    %2 = vector.multi_reduction <add>, %1, %cst [1] : vector<16x128xf32> to vector<16xf32>
    %3 = vector.shape_cast %2 : vector<16xf32> to vector<16x1xf32>
    %4 = math.sqrt %3 : vector<16x1xf32>
    %cst_1 = arith.constant 9.99999996E-13 : f32
    %5 = vector.broadcast %cst_1 : f32 to vector<16x1xf32>
    %6 = arith.maximumf %4, %5 : vector<16x1xf32>
    %7 = vector.broadcast %6 : vector<16x1xf32> to vector<16x128xf32>
    %8 = arith.divf %0, %7 : vector<16x128xf32>
    %9 = arith.truncf %8 : vector<16x128xf32> to vector<16x128xbf16>
    %c0_2 = arith.constant 0 : index
    %c0_3 = arith.constant 0 : index
    %10 = vector.load %arg3[%c0_2, %c0_3] : memref<256x128xbf16, #tpu.memory_space<vmem>>, vector<256x128xbf16>
    %cst_4 = arith.constant dense<0.000000e+00> : vector<16x256xf32>
    %11 = tpu.matmul %9, %10, %cst_4 {dimension_numbers = #tpu.dot_dimension_numbers<[1], [1], [0], [0], [0, 0, 1, 0], [], []>} : vector<16x128xbf16>, vector<256x128xbf16>, vector<16x256xf32> -> vector<16x256xf32>
    %12 = arith.mulf %11, %11 : vector<16x256xf32>
    %cst_5 = arith.constant 1.000000e+00 : f32
    %13 = vector.broadcast %cst_5 : f32 to vector<16x256xf32>
    %14 = arith.subf %13, %12 : vector<16x256xf32>
    %cst_6 = arith.constant 0.000000e+00 : f32
    %15 = vector.broadcast %cst_6 : f32 to vector<16x256xf32>
    %16 = arith.cmpf ogt, %14, %15 : vector<16x256xf32>
    %cst_7 = arith.constant 0.000000e+00 : f32
    %17 = vector.broadcast %cst_7 : f32 to vector<16x256xf32>
    %18 = arith.select %16, %14, %17 : vector<16x256xi1>, vector<16x256xf32>
    %19 = math.sqrt %18 : vector<16x256xf32>
    %cst_8 = arith.constant 0.87758255 : f32
    %20 = vector.broadcast %cst_8 : f32 to vector<16x256xf32>
    %21 = arith.mulf %11, %20 : vector<16x256xf32>
    %cst_9 = arith.constant 0.47942555 : f32
    %22 = vector.broadcast %cst_9 : f32 to vector<16x256xf32>
    %23 = arith.mulf %19, %22 : vector<16x256xf32>
    %24 = arith.subf %21, %23 : vector<16x256xf32>
    %cst_10 = arith.constant -0.87758255 : f32
    %25 = vector.broadcast %cst_10 : f32 to vector<16x256xf32>
    %26 = arith.subf %11, %25 : vector<16x256xf32>
    %cst_11 = arith.constant 0.000000e+00 : f32
    %27 = vector.broadcast %cst_11 : f32 to vector<16x256xf32>
    %28 = arith.cmpf ogt, %26, %27 : vector<16x256xf32>
    %cst_12 = arith.constant 0.239712775 : f32
    %29 = vector.broadcast %cst_12 : f32 to vector<16x256xf32>
    %30 = arith.subf %11, %29 : vector<16x256xf32>
    %31 = arith.select %28, %24, %30 : vector<16x256xi1>, vector<16x256xf32>
    %c256_i32 = arith.constant 256 : i32
    %32 = arith.muli %arg0, %c256_i32 : i32
    %33 = tpu.iota {dimensions = array<i32: 1>} : vector<16x256xi32>
    %34 = vector.broadcast %32 : i32 to vector<16x256xi32>
    %35 = arith.addi %34, %33 : vector<16x256xi32>
    %c0_13 = arith.constant 0 : index
    %c0_14 = arith.constant 0 : index
    %36 = vector.load %arg4[%c0_13, %c0_14] : memref<16x1xi32, #tpu.memory_space<vmem>>, vector<16x1xi32>
    %37 = vector.broadcast %36 : vector<16x1xi32> to vector<16x256xi32>
    %38 = arith.cmpi eq, %35, %37 : vector<16x256xi32>
    %39 = arith.select %38, %31, %11 : vector<16x256xi1>, vector<16x256xf32>
    %cst_15 = arith.constant 3.200000e+01 : f32
    %40 = vector.broadcast %cst_15 : f32 to vector<16x256xf32>
    %41 = arith.mulf %39, %40 : vector<16x256xf32>
    %c0_16 = arith.constant 0 : index
    %c0_17 = arith.constant 0 : index
    %42 = vector.load %arg5[%c0_16, %c0_17] : memref<16x256xf32, #tpu.memory_space<vmem>>, vector<16x256xf32>
    tpu.vector_store %arg5[%c0_16, %c0_17], %41 {strides = array<i32>} : memref<16x256xf32, #tpu.memory_space<vmem>>, vector<16x256xf32>,
    return
  }
  func.func @transform_0(%arg0: i32, %arg1: i32) -> (i32, i32) {
    %c0_i32 = arith.constant 0 : i32
    %c0_i32_0 = arith.constant 0 : i32
    return %arg1, %c0_i32 : i32, i32
  }
  func.func @transform_1(%arg0: i32, %arg1: i32) -> (i32, i32) {
    %c0_i32 = arith.constant 0 : i32
    %c0_i32_0 = arith.constant 0 : i32
    return %arg0, %c0_i32 : i32, i32
  }
  func.func @transform_2(%arg0: i32, %arg1: i32) -> (i32, i32) {
    %c0_i32 = arith.constant 0 : i32
    %c0_i32_0 = arith.constant 0 : i32
    return %arg1, %c0_i32 : i32, i32
  }
  func.func @transform_3(%arg0: i32, %arg1: i32) -> (i32, i32) {
    %c0_i32 = arith.constant 0 : i32
    return %arg1, %arg0 : i32, i32
  }
}

</mosaic_0001>

<bundles_post_ra>
// kernel: tpu_custom_call.1
= control target key start
LH: loop header
LB: loop body
LE: loop exit
PB: predicated region body
PF: predicated region fallthrough
CT: control target
= control target key end

     0   :  { %8 = vsyncpa [#allocation3], 0  ;;  %s669_s0 = inlined_call_operand.vmem [shape: f32[16,128], index: 0, kind: input, shape index: {}]   ;;  %s670_s1 = inlined_call_operand.hbm [shape: bf16[256,128], index: 1, kind: input, shape index: {}]   ;;  %s671_s2 = inlined_call_operand.vmem [shape: s32[16,1], index: 2, kind: input, shape index: {}]   ;;  %s672_s3 = inlined_call_operand.hbm [shape: f32[16,256], index: 3, kind: output, shape index: {}]  }
   0x1   :  { %9 = vsyncpa [#allocation4], 0  ;;  %s16_s14 = sshll.u32 %s670_s1, 4  ;;  %s559_s15 = smov [#allocation2]   ;;  %s17_s14 = int_to_ptr.hbm [resolvable:$true] %s16_s14 }
   0x2   :  { %s18_s16 = sshll.u32 %s559_s15, 4  ;;  %s560_s17 = smov 64   ;;  %s19_s16 = int_to_ptr.vmem [resolvable:$true] %s18_s16 }
   0x3   :  { %s561_s18 = smov 4  }
   0x4   :  { %24 = dma.hbm_to_vmem [thread:$0]  %s17_s14, 2048, %s19_s16, [#allocation3], %s560_s17, %s560_s17, %s561_s18  }
   0x5   :  { %555 = dma.done.wait [#allocation3], 2048  }
   0x6   :  { %556 = vsyncadd [#allocation3], 4294965248  ;;  %v592_v0 = vld [vmem:[%s669_s0] sm:$0xff]  ;;  %v473_v1 = vld [vmem:[#allocation2 + $0x38] sm:$0xff]  ;;  %v562_v39 = vmov 0   ;;  %s381_s28 = sshll.u32 %s672_s3, 4  ;;  %s382_s28 = int_to_ptr.hbm [resolvable:$true] %s381_s28 }
   0x7   :  { %v33_v2 = vmul.f32 %v592_v0, %v592_v0  ;;  %v481_v3 = vld [vmem:[#allocation2 + $0x78] sm:$0xff]  ;;  %224 = vmatpush.bf16.xpose.msra.mxu0 %v473_v1  ;;  %v599_v4 = vld [vmem:[%s669_s0 + $0x8] sm:$0xff]  ;;  %v472_v5 = vld [vmem:[#allocation2 + $0x30] sm:$0xff]  ;;  %489 = vset.pattern.permute.xlu1 %v562_v39  ;;  %s564_s29 = smov 256   ;;  %s565_s30 = smov 16  }
   0x8   :  { %238 = vmatpush.bf16.xpose.msra.mxu1 %v481_v3  ;;  %v34_v6 = vmul.f32 %v599_v4, %v599_v4  ;;  %v480_v7 = vld [vmem:[#allocation2 + $0x70] sm:$0xff]  ;;  %v471_v8 = vld [vmem:[#allocation2 + $0x28] sm:$0xff]  ;;  %v470_v10 = vld [vmem:[#allocation2 + $0x20] sm:$0xff]  ;;  %490 = vset.pattern.permute.xlu0 %v562_v39 }
   0x9   :  { %35 = vadd.xlane.f32.xlu0 %v33_v2  ;;  %v479_v9 = vld [vmem:[#allocation2 + $0x68] sm:$0xff]  ;;  %v478_v11 = vld [vmem:[#allocation2 + $0x60] sm:$0xff]  ;;  %v469_v12 = vld [vmem:[#allocation2 + $0x18] sm:$0xff] }
   0xa   :  { %v477_v13 = vld [vmem:[#allocation2 + $0x58] sm:$0xff]  ;;  %v468_v14 = vld [vmem:[#allocation2 + $0x10] sm:$0xff]  ;;  %v467_v17 = vld [vmem:[#allocation2 + $0x8] sm:$0xff] }
   0xb   :  { %v476_v15 = vld [vmem:[#allocation2 + $0x50] sm:$0xff]  ;;  %v475_v18 = vld [vmem:[#allocation2 + $0x48] sm:$0xff]  ;;  %v466_v23 = vld [vmem:[#allocation2] sm:$0xff] }
   0xc   :  { %v474_v24 = vld [vmem:[#allocation2 + $0x40] sm:$0xff]  ;;  %v352_v44 = vld [vmem:[%s671_s2 + $0x8] sm:$0xff] }
   0xd   :  { %v351_v36 = vld [vmem:[%s671_s2] sm:$0xff]  ;;  %s563_s2 = smov [#allocation5]  }
   0xe   :  { %354 = vperm.xlu1 %489, %v351_v36   ;;  %s379_s25 = sshll.u32 %s563_s2, 4  ;;  %s380_s25 = int_to_ptr.vmem [resolvable:$true] %s379_s25 }
   0xf   :  { %225 = vmatpush.bf16.xpose.msra.mxu0 %v472_v5 }
  0x10   :  { %239 = vmatpush.bf16.xpose.msra.mxu1 %v480_v7 }
  0x11   :  { %37 = vadd.xlane.f32.xlu0 %v34_v6 }
  0x16   :  { %357 = vperm.xlu1 %489, %v352_v44  }
  0x17   :  { %226 = vmatpush.bf16.xpose.msra.mxu0 %v471_v8 }
  0x18   :  { %240 = vmatpush.bf16.xpose.msra.mxu1 %v479_v9 }
  0x1f   :  { %227 = vmatpush.bf16.xpose.msra.mxu0 %v470_v10 }
  0x20   :  { %241 = vmatpush.bf16.xpose.msra.mxu1 %v478_v11 }
  0x27   :  { %228 = vmatpush.bf16.xpose.msra.mxu0 %v469_v12 }
  0x28   :  { %242 = vmatpush.bf16.xpose.msra.mxu1 %v477_v13 }
  0x2f   :  { %229 = vmatpush.bf16.xpose.msra.mxu0 %v468_v14 }
  0x30   :  { %243 = vmatpush.bf16.xpose.msra.mxu1 %v476_v15 }
  0x37   :  { %230 = vmatpush.bf16.xpose.msra.mxu0 %v467_v17 }
  0x38   :  { %244 = vmatpush.bf16.xpose.msra.mxu1 %v475_v18 }
  0x3f   :  { %231 = vmatpush.bf16.xpose.msra.mxu0 %v466_v23 }
  0x40   :  { %245 = vmatpush.bf16.xpose.msra.mxu1 %v474_v24 }
  0x7c   :  { %v36_v16 = vpop.xlane.xlu0 %35 }
  0x7d   :  { %491 = vrsqrt.f32 %v36_v16  ;;  %vm46_vm0 = vcmp.eq.f32.partialorder %v36_v16, inf  ;;  %v49_v32 = vand.u32 2147483648, %v36_v16  ;;  %vm48_vm1 = vcmp.eq.f32.partialorder %v36_v16, 0.0 }
  0x83   :  { %v492_v19 = vpop.eup %491 }
  0x84   :  { %v40_v20 = vmul.f32 %v492_v19, %v36_v16  ;;  %v38_v21 = vpop.xlane.xlu0 %37 }
  0x85   :  { %493 = vrsqrt.f32 %v38_v21  ;;  %vm58_vm2 = vcmp.eq.f32.partialorder %v38_v21, inf  ;;  %v61_v42 = vand.u32 2147483648, %v38_v21  ;;  %vm60_vm3 = vcmp.eq.f32.partialorder %v38_v21, 0.0 }
  0x86   :  { %v41_v22 = vmul.f32 %v492_v19, %v40_v20 }
  0x88   :  { %v42_v25 = vmul.f32 0.5, %v41_v22 }
  0x8a   :  { %v43_v26 = vsub.f32 1.5, %v42_v25 }
  0x8b   :  { %v494_v27 = vpop.eup %493 }
  0x8c   :  { %v44_v28 = vmul.f32 %v492_v19, %v43_v26  ;;  %v52_v29 = vmul.f32 %v494_v27, %v38_v21 }
  0x8e   :  { %v45_v30 = vmul.f32 %v44_v28, %v36_v16  ;;  %v53_v31 = vmul.f32 %v494_v27, %v52_v29  ;;  %v345_v29 = vlaneseq }
  0x90   :  { %v47_v33 = vsel %vm46_vm0, %v36_v16, %v45_v30  ;;  %v54_v34 = vmul.f32 0.5, %v53_v31 }
  0x91   :  { %v50_v35 = vsel %vm48_vm1, %v49_v32, %v47_v33 }
  0x92   :  { %v63_v37 = vmax.f32 %v50_v35, 1e-12  ;;  %v55_v38 = vsub.f32 1.5, %v54_v34 }
  0x94   :  { %495 = vrcp.f32 %v63_v37  ;;  %v56_v40 = vmul.f32 %v494_v27, %v55_v38  ;;  %v76_v54 = vand.u32 2147483648, %v63_v37  ;;  %vm70_vm5 = vweird.f32 %v63_v37 }
  0x95   :  { %v74_v55 = vand.u32 2147483647, %v63_v37 }
  0x96   :  { %v57_v41 = vmul.f32 %v56_v40, %v38_v21  ;;  %v77_v61 = vor.u32 1.1754944e-38, %v76_v54 }
  0x97   :  { %vm75_vm8 = vcmp.eq.f32.partialorder %v74_v55, 8.507059e+37  ;;  %v355_v55 = vpop.permute.xlu1 %354 }
  0x98   :  { %v59_v43 = vsel %vm58_vm2, %v38_v21, %v57_v41 }
  0x99   :  { %v62_v45 = vsel %vm60_vm3, %v61_v42, %v59_v43 }
  0x9a   :  { %v496_v46 = vpop.eup %495  ;;  %v64_v47 = vmax.f32 %v62_v45, 1e-12 }
  0x9b   :  { %v66_v48 = vmul.f32 %v496_v46, %v63_v37  ;;  %vm71_vm4 = vweird.f32 %v496_v46  ;;  %v635_v37 = vand.u32 127, %v345_v29 }
  0x9c   :  { %497 = vrcp.f32 %v64_v47  ;;  %vm72_vm6 = vmor %vm70_vm5, %vm71_vm4  ;;  %v91_v57 = vand.u32 2147483648, %v64_v47  ;;  %v89_v60 = vand.u32 2147483647, %v64_v47  ;;  %vm85_vm9 = vweird.f32 %v64_v47 }
  0x9d   :  { %v67_v49 = vsub.f32 1.0, %v66_v48  ;;  %v347_v54 = vadd.s32 128, %v635_v37  ;;  %vm359_vm4 = vcmp.eq.s32.totalorder %v635_v37, %v355_v55 }
  0x9e   :  { %v92_v1 = vor.u32 1.1754944e-38, %v91_v57  ;;  %vm90_vm11 = vcmp.eq.f32.partialorder %v89_v60, 8.507059e+37 }
  0x9f   :  { %v68_v50 = vmul.f32 %v496_v46, %v67_v49 }
  0xa1   :  { %v69_v52 = vadd.f32 %v496_v46, %v68_v50 }
  0xa2   :  { %v498_v51 = vpop.eup %497 }
  0xa3   :  { %v81_v53 = vmul.f32 %v498_v51, %v64_v47  ;;  %v73_v58 = vsel %vm72_vm6, %v496_v46, %v69_v52  ;;  %vm86_vm7 = vweird.f32 %v498_v51 }
  0xa4   :  { %v78_v63 = vsel %vm75_vm8, %v77_v61, %v73_v58  ;;  %vm87_vm10 = vmor %vm85_vm9, %vm86_vm7  ;;  %vm360_vm7 = vcmp.eq.s32.totalorder %v347_v54, %v355_v55 }
  0xa5   :  { %v82_v56 = vsub.f32 1.0, %v81_v53  ;;  %v79_v5 = vmul.f32 %v78_v63, %v592_v0 }
  0xa7   :  { %v83_v59 = vmul.f32 %v498_v51, %v82_v56 }
  0xa9   :  { %v84_v62 = vadd.f32 %v498_v51, %v83_v59 }
  0xab   :  { %v88_v2 = vsel %vm87_vm10, %v498_v51, %v84_v62 }
  0xac   :  { %v93_v3 = vsel %vm90_vm11, %v92_v1, %v88_v2 }
  0xad   :  { %v94_v6 = vmul.f32 %v93_v3, %v599_v4 }
  0xaf   :  { %v95_v7 = vpack.c.bf16 %v94_v6, %v79_v5 }
  0xb1   :  { %232 = vmatmul.bf16.vlgmr.msra.gmra.mxu0 %v95_v7  ;;  %246 = vmatmul.bf16.vlgmr.msra.gmra.mxu1 %v95_v7 }
 0x12e   :  { %v611_v8 = vpop.f32.mrf.mxu0  ;;  %v613_v9 = vpop.f32.mrf.mxu1 }
 0x12f   :  { %v252_v10 = vmul.f32 %v611_v8, %v611_v8  ;;  %v253_v11 = vmul.f32 %v613_v9, %v613_v9  ;;  %v316_v35 = vmul.f32 0.87758255, %v611_v8  ;;  %v458_v40 = vadd.f32 0.87758255, %v611_v8 }
 0x130   :  { %v459_v42 = vadd.f32 0.87758255, %v613_v9  ;;  %v462_v56 = vadd.f32 -0.23971277, %v611_v8  ;;  %v317_v61 = vmul.f32 0.87758255, %v613_v9 }
 0x131   :  { %v256_v12 = vsub.f32 1.0, %v252_v10  ;;  %v257_v13 = vsub.f32 1.0, %v253_v11  ;;  %v463_v63 = vadd.f32 -0.23971277, %v613_v9  ;;  %vm332_vm5 = vcmp.gt.f32.partialorder %v458_v40, 0.0 }
 0x132   :  { %vm333_vm6 = vcmp.gt.f32.partialorder %v459_v42, 0.0 }
 0x133   :  { %vm260_vm12 = vcmp.gt.f32.partialorder %v256_v12, 0.0  ;;  %vm261_vm13 = vcmp.gt.f32.partialorder %v257_v13, 0.0 }
 0x134   :  { %v264_v14 = vsel %vm260_vm12, %v256_v12, 0.0  ;;  %v265_v0 = vsel %vm261_vm13, %v257_v13, 0.0 }
 0x135   :  { %499 = vrsqrt.f32 %v264_v14  ;;  %vm275_vm0 = vcmp.eq.f32.partialorder %v264_v14, inf  ;;  %v278_v43 = vand.u32 2147483648, %v264_v14  ;;  %vm277_vm1 = vcmp.eq.f32.partialorder %v264_v14, 0.0 }
 0x136   :  { %v619_v4 = vpop.f32.mrf.mxu0  ;;  %v621_v15 = vpop.f32.mrf.mxu1  ;;  %501 = vrsqrt.f32 %v265_v0  ;;  %vm287_vm2 = vcmp.eq.f32.partialorder %v265_v0, inf  ;;  %v290_v49 = vand.u32 2147483648, %v265_v0  ;;  %vm289_vm3 = vcmp.eq.f32.partialorder %v265_v0, 0.0 }
 0x137   :  { %v254_v16 = vmul.f32 %v619_v4, %v619_v4  ;;  %v255_v17 = vmul.f32 %v621_v15, %v621_v15  ;;  %v460_v7 = vadd.f32 0.87758255, %v619_v4 }
 0x139   :  { %v258_v18 = vsub.f32 1.0, %v254_v16  ;;  %v259_v20 = vsub.f32 1.0, %v255_v17  ;;  %vm334_vm12 = vcmp.gt.f32.partialorder %v460_v7, 0.0 }
 0x13b   :  { %v500_v19 = vpop.eup %499  ;;  %vm262_vm14 = vcmp.gt.f32.partialorder %v258_v18, 0.0  ;;  %vm263_vm15 = vcmp.gt.f32.partialorder %v259_v20, 0.0 }
 0x13c   :  { %v269_v21 = vmul.f32 %v500_v19, %v264_v14  ;;  %v502_v22 = vpop.eup %501  ;;  %v627_v23 = vsel %vm262_vm14, %v258_v18, 0.0  ;;  %v630_v26 = vsel %vm263_vm15, %v259_v20, 0.0  ;;  %v318_v20 = vmul.f32 0.87758255, %v619_v4 }
 0x13d   :  { %v281_v25 = vmul.f32 %v502_v22, %v265_v0  ;;  %503 = vrsqrt.f32 %v627_v23  ;;  %vm299_vm8 = vcmp.eq.f32.partialorder %v627_v23, inf  ;;  %v302_v12 = vand.u32 2147483648, %v627_v23 }
 0x13e   :  { %v270_v24 = vmul.f32 %v500_v19, %v269_v21  ;;  %505 = vrsqrt.f32 %v630_v26  ;;  %vm301_vm9 = vcmp.eq.f32.partialorder %v627_v23, 0.0  ;;  %vm311_vm10 = vcmp.eq.f32.partialorder %v630_v26, inf }
 0x13f   :  { %v282_v28 = vmul.f32 %v502_v22, %v281_v25  ;;  %vm313_vm11 = vcmp.eq.f32.partialorder %v630_v26, 0.0  ;;  %v358_v25 = vpop.permute.xlu1 %357 }
 0x140   :  { %v271_v27 = vmul.f32 0.5, %v270_v24  ;;  %vm361_vm13 = vcmp.eq.s32.totalorder %v635_v37, %v358_v25  ;;  %vm362_vm15 = vcmp.eq.s32.totalorder %v347_v54, %v358_v25 }
 0x141   :  { %v283_v31 = vmul.f32 0.5, %v282_v28  ;;  %v319_v28 = vmul.f32 0.87758255, %v621_v15 }
 0x142   :  { %v272_v30 = vsub.f32 1.5, %v271_v27  ;;  %v464_v27 = vadd.f32 -0.23971277, %v619_v4 }
 0x143   :  { %v504_v32 = vpop.eup %503  ;;  %v284_v34 = vsub.f32 1.5, %v283_v31  ;;  %v465_v31 = vadd.f32 -0.23971277, %v621_v15 }
 0x144   :  { %v273_v33 = vmul.f32 %v500_v19, %v272_v30  ;;  %v293_v36 = vmul.f32 %v504_v32, %v627_v23  ;;  %v506_v38 = vpop.eup %505  ;;  %v314_v19 = vand.u32 2147483648, %v630_v26 }
 0x145   :  { %v285_v41 = vmul.f32 %v502_v22, %v284_v34  ;;  %v305_v45 = vmul.f32 %v506_v38, %v630_v26 }
 0x146   :  { %v274_v39 = vmul.f32 %v273_v33, %v264_v14  ;;  %v294_v44 = vmul.f32 %v504_v32, %v293_v36 }
 0x147   :  { %v286_v47 = vmul.f32 %v285_v41, %v265_v0  ;;  %v306_v51 = vmul.f32 %v506_v38, %v305_v45 }
 0x148   :  { %v276_v46 = vsel %vm275_vm0, %v264_v14, %v274_v39  ;;  %v295_v50 = vmul.f32 0.5, %v294_v44 }
 0x149   :  { %v279_v48 = vsel %vm277_vm1, %v278_v43, %v276_v46  ;;  %v288_v53 = vsel %vm287_vm2, %v265_v0, %v286_v47  ;;  %v307_v59 = vmul.f32 0.5, %v306_v51 }
 0x14a   :  { %v320_v52 = vmul.f32 0.47942555, %v279_v48  ;;  %v291_v57 = vsel %vm289_vm3, %v290_v49, %v288_v53  ;;  %v296_v58 = vsub.f32 1.5, %v295_v50 }
 0x14b   :  { %v321_v62 = vmul.f32 0.47942555, %v291_v57  ;;  %v308_v2 = vsub.f32 1.5, %v307_v59 }
 0x14c   :  { %v324_v60 = vsub.f32 %v316_v35, %v320_v52  ;;  %v297_v1 = vmul.f32 %v504_v32, %v296_v58 }
 0x14d   :  { %v325_v3 = vsub.f32 %v317_v61, %v321_v62  ;;  %v309_v10 = vmul.f32 %v506_v38, %v308_v2 }
 0x14e   :  { %v340_v5 = vsel %vm332_vm5, %v324_v60, %v462_v56  ;;  %v298_v6 = vmul.f32 %v297_v1, %v627_v23 }
 0x14f   :  { %v363_v11 = vsel %vm359_vm4, %v340_v5, %v611_v8  ;;  %v341_v13 = vsel %vm333_vm6, %v325_v3, %v463_v63  ;;  %v310_v16 = vmul.f32 %v309_v10, %v630_v26 }
 0x150   :  { %v367_v14 = vmul.f32 32.0, %v363_v11  ;;  %v300_v0 = vsel %vm299_vm8, %v627_v23, %v298_v6  ;;  %v364_v17 = vsel %vm360_vm7, %v341_v13, %v613_v9  ;;  %v461_v23 = vadd.f32 0.87758255, %v621_v15 }
 0x151   :  { %v303_v18 = vsel %vm301_vm9, %v302_v12, %v300_v0  ;;  %v368_v8 = vmul.f32 32.0, %v364_v17  ;;  %v312_v22 = vsel %vm311_vm10, %v630_v26, %v310_v16 }
 0x152   :  { %371 = vst [vmem:[#allocation5] sm:$0xff] %v367_v14  ;;  %v322_v21 = vmul.f32 0.47942555, %v303_v18  ;;  %v315_v24 = vsel %vm313_vm11, %v314_v19, %v312_v22  ;;  %vm335_vm14 = vcmp.gt.f32.partialorder %v461_v23, 0.0 }
 0x153   :  { %372 = vst [vmem:[#allocation5 + $0x8] sm:$0xff] %v368_v8  ;;  %v323_v29 = vmul.f32 0.47942555, %v315_v24 }
 0x154   :  { %v326_v9 = vsub.f32 %v318_v20, %v322_v21 }
 0x155   :  { %v327_v30 = vsub.f32 %v319_v28, %v323_v29 }
 0x156   :  { %v342_v32 = vsel %vm334_vm12, %v326_v9, %v464_v27 }
 0x157   :  { %v365_v26 = vsel %vm361_vm13, %v342_v32, %v619_v4  ;;  %v343_v33 = vsel %vm335_vm14, %v327_v30, %v465_v31 }
 0x158   :  { %v369_v34 = vmul.f32 32.0, %v365_v26  ;;  %v366_v35 = vsel %vm362_vm15, %v343_v33, %v621_v15 }
 0x159   :  { %v370_v36 = vmul.f32 32.0, %v366_v35 }
 0x15a   :  { %373 = vst [vmem:[#allocation5 + $0x10] sm:$0xff] %v369_v34 }
 0x15b   :  { %374 = vst [vmem:[#allocation5 + $0x18] sm:$0xff] %v370_v36 }
 0x15c   :  { %387 = dma.vmem_to_hbm [thread:$0]  %s380_s25, 512, %s382_s28, [#allocation4], %s564_s29, %s564_s29, %s565_s30  }
 0x15d   :  { %557 = dma.done.wait [#allocation4], 512  }
 0x15e   :  { %558 = vsyncadd [#allocation4], 4294966784 }
 0x15f   :  { %392 = vsyncpa [#allocation3], 1 }
 0x160   :  { %393 = vsyncpa [#allocation4], 1 }

</bundles_post_ra>
